<compile_context>
chip_gen: v5e
topology: v5e:2x2
jax: 0.10.0
libtpu: 0.0.40
codegen_flags: <defaults>
</compile_context>

<pallas_src>
import numpy as np
import jax
import jax.numpy as jnp
from jax.experimental import pallas as pl
from jax.experimental.pallas import tpu as pltpu


# ---------------------------------------------------------------------------
# Host-side constants & small helpers
# ---------------------------------------------------------------------------
def _interp_matrix_np(out_size: int, in_size: int, scale: float) -> np.ndarray:
    """1-D bilinear interpolation matrix, PyTorch align_corners=False semantics."""
    dst = np.arange(out_size, dtype=np.float64)
    src = (dst + 0.5) / scale - 0.5
    src = np.maximum(src, 0.0)                        # PyTorch clamps src idx to >= 0
    i0 = np.minimum(np.floor(src).astype(np.int64), in_size - 1)
    i1 = np.minimum(i0 + 1, in_size - 1)
    lam = src - i0
    w = np.zeros((out_size, in_size), dtype=np.float64)
    rows = np.arange(out_size)
    np.add.at(w, (rows, i0), 1.0 - lam)
    np.add.at(w, (rows, i1), lam)
    return w.astype(np.float32)


def _cdiv(a: int, b: int) -> int:
    return -(-a // b)


def _round_up(x: int, m: int) -> int:
    return ((x + m - 1) // m) * m


def _vmem_capacity_bytes() -> int:
    """Best-effort VMEM capacity; fall back to 64 MiB (v7x per-TC, the smallest)."""
    try:
        return int(pltpu.get_tpu_info().vmem_capacity_bytes)
    except Exception:
        return 64 * 1024 * 1024


def _is_v5e() -> bool:
    try:
        kind = jax.devices()[0].device_kind.lower()
        return ("v5 lite" in kind) or ("v5e" in kind) or ("v5litepod" in kind)
    except Exception:
        return False


# ---------------------------------------------------------------------------
# Generic lane-dense "a(M,K) @ w(K,N)" with the contraction dim resident
# ---------------------------------------------------------------------------
def _plan_tiles(M, K, N, itemsize, budget_bytes, min_total_steps):
    """Pick (bm, bn) row/column tile sizes.

    bm: multiple of 8 (sublane aligned), or the full M when M < 8.
    bn: a multiple of 128 that divides N (lane-dense, unmasked vst), else N.
    Budget counts double-buffered a/w/out blocks plus the f32 dot accumulator.
    """
    if N % 128 == 0:
        bn_cands = [d for d in range(N, 127, -128) if N % d == 0]
    else:
        bn_cands = [N]
    if M <= 8:
        bm_cands = [M]
    else:
        top = min(256, _round_up(M, 8))
        bm_cands = list(range(top, 7, -8))

    def fits(bm_c, bn_c):
        in_out = (2 * bm_c * K + 2 * K * bn_c + 2 * bm_c * bn_c) * itemsize
        acc_tmp = bm_c * bn_c * 4          # f32 dot result before astype
        return in_out + acc_tmp <= budget_bytes

    bm, bn = bm_cands[-1], bn_cands[-1]
    found = False
    for bm_c in bm_cands:
        for bn_c in bn_cands:
            if fits(bm_c, bn_c):
                bm, bn = bm_c, bn_c
                found = True
                break
        if found:
            break

    # v7x has 2 TensorCores: aim for >=4 grid steps (>=2 per core) when the
    # shape allows, shrinking the (still lane-dense) column tile first.
    bn_idx = bn_cands.index(bn)
    while _cdiv(M, bm) * _cdiv(N, bn) < min_total_steps:
        if bn_idx + 1 < len(bn_cands):
            bn_idx += 1
            bn = bn_cands[bn_idx]
        elif M > 8 and bm > 8:
            bm = max(8, _round_up(bm // 2, 8))
        else:
            break
    return bm, bn


def _matmul_kernel(a_ref, w_ref, o_ref):
    # a_ref: (bm, K)  w_ref: (K, bn)  o_ref: (bm, bn); f32 MXU accumulation.
    o_ref[...] = jnp.dot(
        a_ref[...], w_ref[...], preferred_element_type=jnp.float32
    ).astype(o_ref.dtype)


def _matmul_resident_k(a, w, out_dtype, *, min_total_steps=4):
    """out(M, N) = a(M, K) @ w(K, N); K stays resident per block (no K grid axis)."""
    M, K = a.shape
    K2, N = w.shape
    assert K == K2, (a.shape, w.shape)
    itemsize = jnp.dtype(a.dtype).itemsize

    vmem_cap = _vmem_capacity_bytes()
    # Per-step in/out budget: ~1/4 of VMEM (v7x: 16 MiB of 64; v5e/v6e capped at
    # 24 MiB of 128) leaves headroom for compiler temps.
    budget = max(4 << 20, min(24 << 20, vmem_cap // 4))
    bm, bn = _plan_tiles(M, K, N, itemsize, budget, min_total_steps)
    n_row, n_col = _cdiv(M, bm), _cdiv(N, bn)

    a_spec = pl.BlockSpec((bm, K), lambda i, j: (i, 0))
    if n_col == 1:
        # Constant block index across the whole grid: single-buffer the resident
        # weights instead of paying 2x VMEM for a buffer that never changes.
        w_spec = pl.BlockSpec((K, bn), lambda i, j: (0, 0),
                              pipeline_mode=pl.Buffered(1))
        w_bufs = 1
    else:
        w_spec = pl.BlockSpec((K, bn), lambda i, j: (0, j))
        w_bufs = 2

    accounted = ((2 * bm * K + w_bufs * K * bn + 2 * bm * bn) * itemsize
                 + bm * bn * 4)
    vmem_limit = int(min(vmem_cap - (4 << 20),
                         max(32 << 20, accounted + (8 << 20))))

    return pl.pallas_call(
        _matmul_kernel,
        out_shape=jax.ShapeDtypeStruct((M, N), out_dtype),
        grid_spec=pltpu.PrefetchScalarGridSpec(
            num_scalar_prefetch=0,
            grid=(n_row, n_col),
            in_specs=[a_spec, w_spec],
            out_specs=pl.BlockSpec((bm, bn), lambda i, j: (i, j)),
        ),
        compiler_params=pltpu.CompilerParams(
            dimension_semantics=("parallel", "parallel"),
            vmem_limit_bytes=vmem_limit,
        ),
    )(a, w)


# ---------------------------------------------------------------------------
# Public op: bilinear upsample (align_corners=False)
# ---------------------------------------------------------------------------
def upsample_bilinear(x: jnp.ndarray, scale: int = 2, *,
                      kron_weight_budget_bytes: int = 4 * 1024 * 1024) -> jnp.ndarray:
    """x: (N, C, H, W) -> (N, C, H*scale, W*scale), bilinear, align_corners=False."""
    N, C, H, W = x.shape
    Ho, Wo = H * scale, W * scale
    NC, HW, HoWo = N * C, H * W, Ho * Wo

    wy = _interp_matrix_np(Ho, H, float(scale))      # (Ho, H)
    wx = _interp_matrix_np(Wo, W, float(scale))      # (Wo, W)

    itemsize = jnp.dtype(x.dtype).itemsize
    kron_bytes = HW * HoWo * itemsize

    use_kron = kron_bytes <= kron_weight_budget_bytes
    # v5e + f32: the dense kron does ~HW/4 redundant MACs per output and f32
    # runs multi-pass on the 128x128 bf16 MXU -> MXU-bound; route big-enough
    # f32 planes to the separable two-matmul path instead.
    if use_kron and x.dtype == jnp.float32 and HW >= 512 and _is_v5e():
        use_kron = False

    if use_kron:
        # One lane-dense MXU matmul: out(NC, HoWo) = x(NC, HW) @ kron(Wy, Wx)^T.
        # Weights cast to x.dtype so bf16 inputs stay on the native bf16 MXU.
        # Note: default MXU precision (bf16 single pass for f32 inputs) gives
        # ~1e-3 relative error; pass precision=HIGHEST upstream if bit parity
        # with PyTorch f32 is ever required.
        w2d = jnp.asarray(np.kron(wy, wx).T, dtype=x.dtype)       # (HW, HoWo)
        out = _matmul_resident_k(x.reshape(NC, HW), w2d, x.dtype)
        return out.reshape(N, C, Ho, Wo)

    # Separable fallback: width pass then height pass, both as lane-dense flat
    # matmuls tiled by the same planner; consistent x.dtype weights throughout.
    # TODO(synk): fuse the inter-pass transpose into the Pallas kernels to save
    # one HBM round-trip of the intermediate.
    wxT = jnp.asarray(wx.T, dtype=x.dtype)                        # (W, Wo)
    wyT = jnp.asarray(wy.T, dtype=x.dtype)                        # (H, Ho)
    t = _matmul_resident_k(x.reshape(NC * H, W), wxT, x.dtype)    # (NC*H, Wo)
    t = t.reshape(NC, H, Wo).transpose(0, 2, 1).reshape(NC * Wo, H)
    o = _matmul_resident_k(t, wyT, x.dtype)                       # (NC*Wo, Ho)
    return o.reshape(NC, Wo, Ho).transpose(0, 2, 1).reshape(N, C, Ho, Wo)


if __name__ == "__main__":
    key = jax.random.PRNGKey(0)
    N, C, H, W = 2, 4, 16, 16
    x = jax.random.normal(key, (N, C, H, W), dtype=jnp.float32)

    out = jax.block_until_ready(upsample_bilinear(x, scale=2))

    # Pure-JAX reference with the same interpolation matrices at HIGHEST
    # precision, so the reference itself is not reduced-precision.
    wy_ref = jnp.asarray(_interp_matrix_np(2 * H, H, 2.0))
    wx_ref = jnp.asarray(_interp_matrix_np(2 * W, W, 2.0))
    ref = jnp.einsum("oh,nchw,xw->ncox", wy_ref, x, wx_ref,
                     precision=jax.lax.Precision.HIGHEST)

    assert out.shape == (N, C, 2 * H, 2 * W), out.shape
    max_err = float(jnp.max(jnp.abs(out - ref)))
    # Tolerance covers default-precision (bf16 single-pass) MXU on f32 inputs;
    # any indexing/weight bug would show up as O(0.1+) errors.
    assert max_err < 2e-2, f"mismatch, max_err={max_err}"
    print("KERNEL_OK")
</pallas_src>

<mosaic_0001>
module attributes {stable_mosaic.version = 11 : i64} {
  func.func @_matmul_kernel(%arg0: i32, %arg1: i32, %arg2: memref<8x256xf32, #tpu.memory_space<vmem>>, %arg3: memref<256x256xf32, #tpu.memory_space<vmem>>, %arg4: memref<8x256xf32, #tpu.memory_space<vmem>>) attributes {dimension_semantics = [#tpu.dimension_semantics<parallel>, #tpu.dimension_semantics<parallel>], iteration_bounds = array<i64: 1, 4>, scalar_prefetch = 0 : i64, scratch_operands = 0 : i64, tpu.core_type = #tpu.core_type<tc>, window_params = [{transform_indices = @transform_0, window_bounds = array<i64: 8, 256>}, {transform_indices = @transform_1, window_bounds = array<i64: 256, 256>}, {transform_indices = @transform_2, window_bounds = array<i64: 8, 256>}]} {
    %c0 = arith.constant 0 : index
    %c0_0 = arith.constant 0 : index
    %0 = vector.load %arg2[%c0, %c0_0] : memref<8x256xf32, #tpu.memory_space<vmem>>, vector<8x256xf32>
    %c0_1 = arith.constant 0 : index
    %c0_2 = arith.constant 0 : index
    %1 = vector.load %arg3[%c0_1, %c0_2] : memref<256x256xf32, #tpu.memory_space<vmem>>, vector<256x256xf32>
    %cst = arith.constant dense<0.000000e+00> : vector<8x256xf32>
    %2 = tpu.matmul %0, %1, %cst {dimension_numbers = #tpu.dot_dimension_numbers<[1], [0], [0], [1], [0, 0, 1, 1], [], []>} : vector<8x256xf32>, vector<256x256xf32>, vector<8x256xf32> -> vector<8x256xf32>
    %c0_3 = arith.constant 0 : index
    %c0_4 = arith.constant 0 : index
    %3 = vector.load %arg4[%c0_3, %c0_4] : memref<8x256xf32, #tpu.memory_space<vmem>>, vector<8x256xf32>
    tpu.vector_store %arg4[%c0_3, %c0_4], %2 {strides = array<i32>} : memref<8x256xf32, #tpu.memory_space<vmem>>, vector<8x256xf32>,
    return
  }
  func.func @transform_0(%arg0: i32, %arg1: i32) -> (i32, i32) {
    %c0_i32 = arith.constant 0 : i32
    %c0_i32_0 = arith.constant 0 : i32
    return %arg0, %c0_i32 : i32, i32
  }
  func.func @transform_1(%arg0: i32, %arg1: i32) -> (i32, i32) {
    %c0_i32 = arith.constant 0 : i32
    %c0_i32_0 = arith.constant 0 : i32
    return %c0_i32, %arg1 : i32, i32
  }
  func.func @transform_2(%arg0: i32, %arg1: i32) -> (i32, i32) {
    %c0_i32 = arith.constant 0 : i32
    return %arg0, %arg1 : i32, i32
  }
}

</mosaic_0001>

<bundles_post_ra>
// kernel: tpu_custom_call.1
= control target key start
LH: loop header
LB: loop body
LE: loop exit
PB: predicated region body
PF: predicated region fallthrough
CT: control target
= control target key end

     0   :  { %s943_s0 = inlined_call_operand.hbm [shape: f32[8,256], index: 0, kind: input, shape index: {}]   ;;  %s944_s1 = inlined_call_operand.hbm [shape: f32[256,1024], index: 1, kind: input, shape index: {}]   ;;  %s945_s2 = inlined_call_operand.hbm [shape: f32[8,1024], index: 2, kind: output, shape index: {}]  }
   0x1   :  { %946 = sst [smem:[#allocation11_spill]] %s943_s0 }
   0x2   :  { %7 = vsyncpa [#allocation3], 0 }
   0x3   :  { %8 = vsyncpa [#allocation6], 0 }
   0x4   :  { %10 = vsyncpa [#allocation6 + $0x1], 0 }
   0x5   :  { %11 = vsyncpa [#allocation4], 0 }
   0x6   :  { %13 = vsyncpa [#allocation4 + $0x1], 0  ;;  %s727_s9 = smov 0   ;;  %s729_s10 = smov 0  }
   0x7   :  { %s731_s11 = smov 0   ;;  %s733_s12 = smov 0  }
   0x8   :  { %s735_s13 = smov 0   ;;  %s737_s14 = smov 0  }
   0x9 LB: > { %s465_s15 = sadd.s32 4294967295, %s706_s14   ;;  %s466_s16 = sadd.s32 4294967294, %s706_s14   ;;  %s706_s14 = sphi %s737_s14, %s19_s14   ;;  %s702_s13 = sphi %s735_s13, %s959_s13   ;;  %s698_s12 = sphi %s733_s12, %s958_s12   ;;  %s694_s11 = sphi %s731_s11, %s957_s11   ;;  %s690_s10 = sphi %s729_s10, %s956_s10   ;;  %s686_s9 = sphi %s727_s9, %s955_s9  }
   0xa   : > { %s64_s17 = sadd.s32 1, %s694_s11  ;;  %p71_p0 = scmp.ne.s32.totalorder %s694_s11, %s690_s10 }
   0xb   : > { %p72_p1 = scmp.eq.s32.totalorder %s706_s14, 0  ;;  %p77_p2 = scmp.ne.s32.totalorder %s690_s10, %s686_s9 }
   0xc   : > { %p765_p3 = scmp.eq.s32.totalorder %s465_s15, 0  ;;  %p103_p4 = scmp.eq.s32.totalorder %s465_s15, 3 }
   0xd   : > { %p769_p5 = por %p72_p1, %p71_p0  ;;  %p109_p6 = scmp.eq.s32.totalorder %s466_s16, 3 }
   0xe   : > { %p775_p7 = por %p765_p3, %p77_p2  ;;  %p779_p8 = por %p103_p4, %p71_p0 }
   0xf   : > { %p783_p9 = por %p109_p6, %p77_p2  ;;  %p467_p10 = scmp.ge.s32.totalorder %s706_s14, 1 }
  0x10   : > { %p116_p11 = scmp.lt.s32.totalorder %s706_s14, 5  ;;  %s952_s0 = sld [smem:[#allocation11_spill]] }
  0x11   : > { %s708_s27 = smov [#allocation2]   ;;  %p505_p0 = scmp.lt.s32.totalorder %s706_s14, 4 }
  0x12   : > { %p792_p12 = pnand %p467_p10, %p116_p11  ;;  %s133_s28 = sshll.u32 %s708_s27, 4  ;;  %s134_s28 = int_to_ptr.vmem [resolvable:$true] %s133_s28 }
  0x13   : > { %p803_p2 = pnand %p505_p0, %p769_p5  ;;  %s28_s30 = sadd.s32 1, %s702_s13 }
  0x14   : > { %p492_p13 = pneg %p792_p12  ;;  %p29_p4 = scmp.ge.s32.totalorder %s28_s30, 4 }
  0x15   : > { %s144_s3 = sand.u32 1, %s694_s11   ;;  %s482_s6 = sshll.u32 %s702_s13, 4 }
  0x16   : > { %s131_s25 = sshll.u32 %s952_s0, 4  ;;  %p493_p1 = pnand %p492_p13, %p765_p3  ;;  %s132_s25 = int_to_ptr.hbm [resolvable:$true] %s131_s25 }
  0x17   : > { %s961_s30 = smov (%p29_p4, %s28_s30), 0  ;;  %s470_s4 = sshll.u32 %s144_s3, 9 }
  0x18   : > { %495 = dma.hbm_to_vmem [thread:$0]  (!%p493_p1), %s132_s25, 256, %s134_s28, [#allocation3]  }
  0x19   : > { %s61_s5 = ssub.s32 %s702_s13, %s961_s30  ;;  %s153_s15 = scalar_lea.hbm %s944_s1, %s482_s6 }
  0x1a   : > { %p62_p6 = scmp.eq.s32.totalorder %s61_s5, 0  ;;  %s148_s16 = scalar_lea.vmem [#allocation5], %s470_s4 }
  0x1b   : > { %s156_s19 = sshll.u32 %s148_s16, 4  ;;  %s154_s24 = sshll.u32 %s153_s15, 4  ;;  %s157_s19 = int_to_ptr.vmem [resolvable:$true] %s156_s19  ;;  %s155_s24 = int_to_ptr.hbm [resolvable:$true] %s154_s24 }
  0x1c   : > { %s820_s23 = scalar_select %p62_p6, %s694_s11, %s64_s17  }
  0x1d   : > { %s145_s25 = scalar_lea.sflag [#allocation6], %s144_s3  ;;  %s709_s27 = smov 1024  }
  0x1e   : > { %s710_s28 = smov 256   ;;  %s711_s0 = smov 16  }
  0x1f   : > { %499 = dma.hbm_to_vmem [thread:$0]  (!%p803_p2), %s155_s24, 8192, %s157_s19, %s145_s25, %s709_s27, %s710_s28, %s711_s0  }
  0x20   : > { %168 = sbr.rel (%p792_p12) target bundleno = 212 (0xd4), region = 28 }
  0x25   : > { %673 = dma.done.wait (%p765_p3), [#allocation3], 256  }
  0x26   : > { %675 = vsyncadd (%p765_p3), [#allocation3], 4294967040  ;;  %s831_s17 = sand.u32 1, %s690_s10  }
  0x27   : > { %s475_s3 = sshll.u32 %s831_s17, 9  ;;  %s176_s4 = scalar_lea.sflag [#allocation6], %s831_s17 }
  0x28   : > { %s835_s5 = scalar_lea.vmem [#allocation5], %s475_s3 }
  0x29   : > { %677 = dma.done.wait (%p775_p7), %s176_s4, 8192  }
  0x2a   : > { %679 = vsyncadd (%p775_p7), %s176_s4, 4294959104  ;;  %v236_v0 = vld [vmem:[%s835_s5 + $0xf8] sm:$0xff]  ;;  %v234_v2 = vld [vmem:[%s835_s5 + $0xe8] sm:$0xff]  ;;  %s476_s0 = sshll.u32 %s831_s17, 4  ;;  %s483_s18 = sshll.u32 %s698_s12, 4 }
  0x2b   : > { %v268_v1 = vld [vmem:[%s835_s5 + $0x1f8] sm:$0xff]  ;;  %309 = vmatpush.msra.mxu2 %v236_v0  ;;  %v266_v3 = vld [vmem:[%s835_s5 + $0x1e8] sm:$0xff]  ;;  %v235_v6 = vld [vmem:[%s835_s5 + $0xf0] sm:$0xff]  ;;  %s365_s29 = scalar_lea.hbm %s945_s2, %s483_s18  ;;  %s200_s6 = scalar_lea.vmem [#allocation7], %s476_s0 }
  0x2c   : > { %329 = vmatpush.msra.mxu3 %v268_v1  ;;  %v232_v4 = vld [vmem:[%s835_s5 + $0xd8] sm:$0xff]  ;;  %v267_v7 = vld [vmem:[%s835_s5 + $0x1f0] sm:$0xff]  ;;  %v233_v8 = vld [vmem:[%s835_s5 + $0xe0] sm:$0xff]  ;;  %269 = vmatpush.msra.mxu0 %v235_v6  ;;  %s367_s7 = sshll.u32 %s200_s6, 4  ;;  %s369_s8 = sshll.u32 %s365_s29, 4  ;;  %s368_s7 = int_to_ptr.vmem [resolvable:$true] %s367_s7  ;;  %s370_s8 = int_to_ptr.hbm [resolvable:$true] %s369_s8 }
  0x2d   : > { %v264_v5 = vld [vmem:[%s835_s5 + $0x1d8] sm:$0xff]  ;;  %310 = vmatpush.msra.mxu2 %v234_v2  ;;  %v265_v9 = vld [vmem:[%s835_s5 + $0x1e0] sm:$0xff]  ;;  %289 = vmatpush.msra.mxu1 %v267_v7  ;;  %v230_v10 = vld [vmem:[%s835_s5 + $0xc8] sm:$0xff]  ;;  %s352_s15 = scalar_lea.sflag [#allocation4], %s831_s17  ;;  %s634_s12 = sshra.s32 %s370_s8, 4  ;;  %s635_s12 = int_to_ptr.hbm [resolvable:$true] %s634_s12 }
  0x2e   : > { %330 = vmatpush.msra.mxu3 %v266_v3  ;;  %v262_v11 = vld [vmem:[%s835_s5 + $0x1c8] sm:$0xff]  ;;  %v231_v12 = vld [vmem:[%s835_s5 + $0xd0] sm:$0xff]  ;;  %270 = vmatpush.msra.mxu0 %v233_v8  ;;  %v228_v14 = vld [vmem:[%s835_s5 + $0xb8] sm:$0xff]  ;;  %s636_s16 = scalar_lea.hbm %s635_s12, 16  ;;  %s640_s25 = scalar_lea.hbm %s945_s2, 64 }
  0x2f   : > { %311 = vmatpush.msra.mxu2 %v232_v4  ;;  %v263_v13 = vld [vmem:[%s835_s5 + $0x1d0] sm:$0xff]  ;;  %290 = vmatpush.msra.mxu1 %v265_v9  ;;  %v260_v15 = vld [vmem:[%s835_s5 + $0x1b8] sm:$0xff]  ;;  %v229_v16 = vld [vmem:[%s835_s5 + $0xc0] sm:$0xff]  ;;  %p637_p3 = scmp.ne.s32.totalorder %s635_s12, %s636_s16  ;;  %p641_p10 = scmp.lt.s32.totalorder %s635_s12, %s945_s2 }
  0x30   : > { %331 = vmatpush.msra.mxu3 %v264_v5  ;;  %v261_v17 = vld [vmem:[%s835_s5 + $0x1c0] sm:$0xff]  ;;  %271 = vmatpush.msra.mxu0 %v231_v12  ;;  %v226_v18 = vld [vmem:[%s835_s5 + $0xa8] sm:$0xff]  ;;  %v227_v20 = vld [vmem:[%s835_s5 + $0xb0] sm:$0xff]  ;;  %p642_p11 = scmp.lt.s32.totalorder %s640_s25, %s636_s16 }
  0x31   : > { %312 = vmatpush.msra.mxu2 %v230_v10  ;;  %291 = vmatpush.msra.mxu1 %v263_v13  ;;  %v258_v19 = vld [vmem:[%s835_s5 + $0x1a8] sm:$0xff]  ;;  %v259_v21 = vld [vmem:[%s835_s5 + $0x1b0] sm:$0xff]  ;;  %v224_v22 = vld [vmem:[%s835_s5 + $0x98] sm:$0xff]  ;;  %p638_p5 = pnand %p637_p3, %p779_p8 }
  0x32   : > { %332 = vmatpush.msra.mxu3 %v262_v11  ;;  %272 = vmatpush.msra.mxu0 %v229_v16  ;;  %v256_v23 = vld [vmem:[%s835_s5 + $0x198] sm:$0xff]  ;;  %v225_v24 = vld [vmem:[%s835_s5 + $0xa0] sm:$0xff]  ;;  %v222_v26 = vld [vmem:[%s835_s5 + $0x88] sm:$0xff]  ;;  %p643_p12 = por %p642_p11, %p641_p10 }
  0x33   : > { %313 = vmatpush.msra.mxu2 %v228_v14  ;;  %292 = vmatpush.msra.mxu1 %v261_v17  ;;  %v257_v25 = vld [vmem:[%s835_s5 + $0x1a0] sm:$0xff]  ;;  %v254_v27 = vld [vmem:[%s835_s5 + $0x188] sm:$0xff]  ;;  %v223_v28 = vld [vmem:[%s835_s5 + $0x90] sm:$0xff]  ;;  %p639_p7 = pneg %p638_p5 }
  0x34   : > { %333 = vmatpush.msra.mxu3 %v260_v15  ;;  %273 = vmatpush.msra.mxu0 %v227_v20  ;;  %v255_v29 = vld [vmem:[%s835_s5 + $0x190] sm:$0xff]  ;;  %v220_v30 = vld [vmem:[%s835_s5 + $0x78] sm:$0xff]  ;;  %v221_v32 = vld [vmem:[%s835_s5 + $0x80] sm:$0xff] }
  0x35   : > { %314 = vmatpush.msra.mxu2 %v226_v18  ;;  %293 = vmatpush.msra.mxu1 %v259_v21  ;;  %v252_v31 = vld [vmem:[%s835_s5 + $0x178] sm:$0xff]  ;;  %v253_v33 = vld [vmem:[%s835_s5 + $0x180] sm:$0xff]  ;;  %v218_v34 = vld [vmem:[%s835_s5 + $0x68] sm:$0xff]  ;;  %p644_p13 = pnand %p643_p12, %p639_p7 }
  0x36   : > { %334 = vmatpush.msra.mxu3 %v258_v19  ;;  %274 = vmatpush.msra.mxu0 %v225_v24  ;;  %v250_v35 = vld [vmem:[%s835_s5 + $0x168] sm:$0xff]  ;;  %v219_v36 = vld [vmem:[%s835_s5 + $0x70] sm:$0xff]  ;;  %v216_v38 = vld [vmem:[%s835_s5 + $0x58] sm:$0xff] }
  0x37   : > { %315 = vmatpush.msra.mxu2 %v224_v22  ;;  %294 = vmatpush.msra.mxu1 %v257_v25  ;;  %v251_v37 = vld [vmem:[%s835_s5 + $0x170] sm:$0xff]  ;;  %v248_v39 = vld [vmem:[%s835_s5 + $0x158] sm:$0xff]  ;;  %v217_v40 = vld [vmem:[%s835_s5 + $0x60] sm:$0xff] }
  0x38   : > { %335 = vmatpush.msra.mxu3 %v256_v23  ;;  %275 = vmatpush.msra.mxu0 %v223_v28  ;;  %v249_v41 = vld [vmem:[%s835_s5 + $0x160] sm:$0xff]  ;;  %v214_v42 = vld [vmem:[%s835_s5 + $0x48] sm:$0xff]  ;;  %v215_v44 = vld [vmem:[%s835_s5 + $0x50] sm:$0xff] }
  0x39   : > { %316 = vmatpush.msra.mxu2 %v222_v26  ;;  %295 = vmatpush.msra.mxu1 %v255_v29  ;;  %v246_v43 = vld [vmem:[%s835_s5 + $0x148] sm:$0xff]  ;;  %v247_v45 = vld [vmem:[%s835_s5 + $0x150] sm:$0xff]  ;;  %v212_v46 = vld [vmem:[%s835_s5 + $0x38] sm:$0xff] }
  0x3a   : > { %336 = vmatpush.msra.mxu3 %v254_v27  ;;  %276 = vmatpush.msra.mxu0 %v221_v32  ;;  %v244_v47 = vld [vmem:[%s835_s5 + $0x138] sm:$0xff]  ;;  %v213_v48 = vld [vmem:[%s835_s5 + $0x40] sm:$0xff]  ;;  %v210_v50 = vld [vmem:[%s835_s5 + $0x28] sm:$0xff] }
  0x3b   : > { %317 = vmatpush.msra.mxu2 %v220_v30  ;;  %296 = vmatpush.msra.mxu1 %v253_v33  ;;  %v245_v49 = vld [vmem:[%s835_s5 + $0x140] sm:$0xff]  ;;  %v242_v51 = vld [vmem:[%s835_s5 + $0x128] sm:$0xff]  ;;  %v211_v52 = vld [vmem:[%s835_s5 + $0x30] sm:$0xff] }
  0x3c   : > { %337 = vmatpush.msra.mxu3 %v252_v31  ;;  %277 = vmatpush.msra.mxu0 %v219_v36  ;;  %v243_v53 = vld [vmem:[%s835_s5 + $0x130] sm:$0xff]  ;;  %v208_v54 = vld [vmem:[%s835_s5 + $0x18] sm:$0xff]  ;;  %v209_v56 = vld [vmem:[%s835_s5 + $0x20] sm:$0xff] }
  0x3d   : > { %318 = vmatpush.msra.mxu2 %v218_v34  ;;  %297 = vmatpush.msra.mxu1 %v251_v37  ;;  %v240_v55 = vld [vmem:[%s835_s5 + $0x118] sm:$0xff]  ;;  %v241_v57 = vld [vmem:[%s835_s5 + $0x120] sm:$0xff]  ;;  %v206_v58 = vld [vmem:[%s835_s5 + $0x8] sm:$0xff] }
  0x3e   : > { %338 = vmatpush.msra.mxu3 %v250_v35  ;;  %278 = vmatpush.msra.mxu0 %v217_v40  ;;  %v238_v59 = vld [vmem:[%s835_s5 + $0x108] sm:$0xff]  ;;  %v203_v60 = vld [vmem:[#allocation2] sm:$0xff]  ;;  %v204_v61 = vld [vmem:[#allocation2 + $0x8] sm:$0xff] }
  0x3f   : > { %319 = vmatpush.msra.mxu2 %v216_v38  ;;  %298 = vmatpush.msra.mxu1 %v249_v41  ;;  %v207_v62 = vld [vmem:[%s835_s5 + $0x10] sm:$0xff]  ;;  %v205_v0 = vld [vmem:[%s835_s5] sm:$0xff] }
  0x40   : > { %339 = vmatpush.msra.mxu3 %v248_v39  ;;  %279 = vmatpush.msra.mxu0 %v215_v44  ;;  %v239_v63 = vld [vmem:[%s835_s5 + $0x110] sm:$0xff]  ;;  %v237_v1 = vld [vmem:[%s835_s5 + $0x100] sm:$0xff] }
  0x41   : > { %320 = vmatpush.msra.mxu2 %v214_v42  ;;  %299 = vmatpush.msra.mxu1 %v247_v45 }
  0x42   : > { %340 = vmatpush.msra.mxu3 %v246_v43  ;;  %280 = vmatpush.msra.mxu0 %v213_v48 }
  0x43   : > { %321 = vmatpush.msra.mxu2 %v212_v46  ;;  %300 = vmatpush.msra.mxu1 %v245_v49 }
  0x44   : > { %341 = vmatpush.msra.mxu3 %v244_v47  ;;  %281 = vmatpush.msra.mxu0 %v211_v52 }
  0x45   : > { %322 = vmatpush.msra.mxu2 %v210_v50  ;;  %301 = vmatpush.msra.mxu1 %v243_v53 }
  0x46   : > { %342 = vmatpush.msra.mxu3 %v242_v51  ;;  %282 = vmatpush.msra.mxu0 %v209_v56 }
  0x47   : > { %323 = vmatpush.msra.mxu2 %v208_v54  ;;  %302 = vmatpush.msra.mxu1 %v241_v57 }
  0x48   : > { %343 = vmatpush.msra.mxu3 %v240_v55  ;;  %283 = vmatpush.msra.mxu0 %v207_v62 }
  0x49   : > { %324 = vmatpush.msra.mxu2 %v206_v58  ;;  %303 = vmatpush.msra.mxu1 %v239_v63 }
  0x4a   : > { %344 = vmatpush.msra.mxu3 %v238_v59  ;;  %325 = vmatmul.f32.vlgmr.msra.gmra.mxu2 %v203_v60 }
  0x4b   : > { %345 = vmatmul.f32.vlgmr.msra.gmra.mxu3 %v204_v61  ;;  %284 = vmatpush.msra.mxu0 %v205_v0 }
  0x4c   : > { %304 = vmatpush.msra.mxu1 %v237_v1  ;;  %285 = vmatmul.f32.vlgmr.msra.gmra.mxu0 %v203_v60 }
  0x4d   : > { %305 = vmatmul.f32.vlgmr.msra.gmra.mxu1 %v204_v61 }
  0xc9   : > { %v286_v2 = vpop.f32.mrf.mxu0 }
  0xca   : > { %v306_v3 = vpop.f32.mrf.mxu1 }
  0xcb   : > { %v307_v4 = vadd.f32 %v306_v3, %v286_v2 }
  0xcd   : > { %v326_v5 = vpop.f32.mrf.mxu2  ;;  %349 = vst [vmem:[%s200_s6] sm:$0xff] %v307_v4 }
  0xce   : > { %v346_v6 = vpop.f32.mrf.mxu3 }
  0xcf   : > { %v347_v7 = vadd.f32 %v346_v6, %v326_v5 }
  0xd1   : > { %350 = vst [vmem:[%s200_s6 + $0x8] sm:$0xff] %v347_v7 }
  0xd2   : > { %647 = shalt.err (!%p644_p13)
}
  0xd3   : > { %490 = dma.vmem_to_hbm [thread:$0]  (%p779_p8), %s368_s7, 256, %s370_s8, %s352_s15  }
  0xd4 PF: > { %p507_p0 = scmp.ge.s32.totalorder %s706_s14, 2  ;;  %s381_s17 = sand.u32 1, %s686_s9  }
  0xd5   : > { %s382_s3 = scalar_lea.sflag [#allocation4], %s381_s17 }
  0xd6   : > { %p501_p1 = pnand %p507_p0, %p783_p9 }
  0xd8   : > { %p502_p2 = pneg %p501_p1 }
  0xda   : > { %681 = dma.done.wait (%p502_p2), %s382_s3, 256  }
  0xdb   : > { %683 = vsyncadd (%p502_p2), %s382_s3, 4294967040  ;;  %s19_s14 = sadd.s32 1, %s706_s14   ;;  %s955_s9 = smov %s690_s10 }
  0xdc   : > { %p16_p4 = scmp.ge.s32.totalorder %s19_s14, 6   ;;  %s956_s10 = smov %s694_s11 }
  0xdd   : > { %s957_s11 = smov %s820_s23  ;;  %s958_s12 = smov %s702_s13 }
  0xde   : > { %s959_s13 = smov %s961_s30  ;;  %18 = sbr.rel (!%p16_p4) target bundleno = 9 (0x9), region = 79 }
  0xe3   :  { %388 = vsyncpa [#allocation3], 1 }
  0xe4   :  { %390 = vsyncpa [#allocation3 + $0x1], 1 }
  0xe5   :  { %391 = vsyncpa [#allocation6], 1 }
  0xe6   :  { %393 = vsyncpa [#allocation6 + $0x1], 1 }
  0xe7   :  { %394 = vsyncpa [#allocation4], 1 }
  0xe8   :  { %396 = vsyncpa [#allocation4 + $0x1], 1 }

</bundles_post_ra>
